<compile_context>
chip_gen: v7x
topology: tpu7x:2x2x1
jax: 0.10.0
libtpu: 0.0.40
codegen_flags: <defaults>
</compile_context>

<pallas_src>
import functools
import math

import numpy as np

import jax
import jax.numpy as jnp
from jax import lax
from jax.experimental import pallas as pl
from jax.experimental.pallas import tpu as pltpu


# ----------------------------------------------------------------------------
# Kernel
# ----------------------------------------------------------------------------
def _basic_block_kernel(x_ref, w1_ref, b1_ref, w2_ref, b2_ref, o_ref, *, H):
    """Fused BasicBlock forward for one block of M = B_blk * H image rows.

    x_ref  : (M, W*Cin)          input rows (compute dtype), lane = w*Cin + ci
    w1_ref : (W*Cin, 4*W*Cout)   [conv1 kh=0 | kh=1 | kh=2 | 1x1 shortcut]
    b1_ref : (1, W*Cout)         conv1 bias tiled over W (f32)
    w2_ref : (W*Cout, 3*W*Cout)  [conv2 kh=0 | kh=1 | kh=2]
    b2_ref : (1, W*Cout)         conv2 bias tiled over W (f32)
    o_ref  : (M, W*Cout)         output rows, lane dense
    """
    M = x_ref.shape[0]
    Nc = o_ref.shape[-1]                          # W*Cout (multiple of 128)

    # Row-within-image index; the masks kill rows that would wrap across
    # image (or block) boundaries in the sublane rolls below.  This is the
    # SAME zero-padding along H, with no halo rows materialised.
    row = lax.broadcasted_iota(jnp.int32, (M, 1), 0) % H
    not_top = row != 0                            # row h has a row h-1 above
    not_bot = row != (H - 1)                      # row h has a row h+1 below

    def vert_mix(z):
        """Combine the 3 kh bands of an (M, 3*Nc) f32 slab.

        Output row r needs band kh=0 evaluated at input row r-1, band kh=1 at
        row r, and band kh=2 at row r+1 (zero outside the image).
        """
        z_above = pltpu.roll(z[:, 0:Nc], shift=1, axis=0)             # z0[r-1]
        z_below = pltpu.roll(z[:, 2 * Nc:3 * Nc], shift=M - 1, axis=0)  # z2[r+1]
        return (jnp.where(not_top, z_above, 0.0)
                + z[:, Nc:2 * Nc]
                + jnp.where(not_bot, z_below, 0.0))

    x = x_ref[...]

    # conv1 (3 kh bands) + 1x1 shortcut in ONE MXU matmul, f32 accumulation.
    z1 = jnp.dot(x, w1_ref[...], preferred_element_type=jnp.float32)
    identity = z1[:, 3 * Nc:4 * Nc]
    h1 = jnp.maximum(vert_mix(z1[:, 0:3 * Nc]) + b1_ref[...], 0.0)

    # conv2 (3 kh bands) in ONE MXU matmul on the lane-dense intermediate.
    z2 = jnp.dot(h1.astype(w2_ref.dtype), w2_ref[...],
                 preferred_element_type=jnp.float32)
    out = jnp.maximum(vert_mix(z2) + b2_ref[...] + identity, 0.0)
    o_ref[...] = out.astype(o_ref.dtype)


# ----------------------------------------------------------------------------
# One-time weight repack (numpy, outside jit / the hot path)
# ----------------------------------------------------------------------------
def _banded_conv3x3(taps, cin, cout, W):
    """taps: (3, 3, cin, cout).  Returns 3 banded (W*cin, W*cout) matrices,
    one per kh; SAME padding along W is encoded by omitting out-of-range kw
    taps from the block-Toeplitz structure."""
    mats = []
    for kh in range(3):
        m = np.zeros((W, cin, W, cout), np.float32)
        for kw in range(3):
            for w_out in range(W):
                w_in = w_out + kw - 1
                if 0 <= w_in < W:
                    m[w_in, :, w_out, :] = taps[kh, kw]
        mats.append(m.reshape(W * cin, W * cout))
    return mats


def _banded_1x1(ws_ic, cin, cout, W):
    """ws_ic: (cin, cout).  Block-diagonal (W*cin, W*cout) matrix."""
    m = np.zeros((W, cin, W, cout), np.float32)
    for w in range(W):
        m[w, :, w, :] = ws_ic
    return m.reshape(W * cin, W * cout)


def pack_basic_block_params(w1_oihw, b1, w2_oihw, b2, ws_oihw, W):
    """Repack PyTorch-layout BasicBlock weights into the banded block-Toeplitz
    operands consumed by the kernel.  Done once per weight set."""
    w1 = np.asarray(w1_oihw, np.float32)          # (Cout, Cin, 3, 3)
    w2 = np.asarray(w2_oihw, np.float32)          # (Cout, Cout, 3, 3)
    cout, cin = int(w1.shape[0]), int(w1.shape[1])
    t1 = np.transpose(w1, (2, 3, 1, 0))           # (kh, kw, ci, co)
    t2 = np.transpose(w2, (2, 3, 1, 0))
    if ws_oihw is None:                           # identity shortcut (cin==cout)
        if cin != cout:
            raise ValueError("shortcut weights required when cin != cout")
        ws_ic = np.eye(cin, dtype=np.float32)
    else:
        ws_ic = np.asarray(ws_oihw, np.float32).reshape(cout, cin).T

    m1 = _banded_conv3x3(t1, cin, cout, W)
    m2 = _banded_conv3x3(t2, cout, cout, W)
    msc = _banded_1x1(ws_ic, cin, cout, W)

    w1_full = np.concatenate(m1 + [msc], axis=1)  # (W*Cin, 4*W*Cout)
    w2_full = np.concatenate(m2, axis=1)          # (W*Cout, 3*W*Cout)
    b1_row = np.tile(np.asarray(b1, np.float32), W).reshape(1, W * cout)
    b2_row = np.tile(np.asarray(b2, np.float32), W).reshape(1, W * cout)
    return (jnp.asarray(w1_full), jnp.asarray(b1_row),
            jnp.asarray(w2_full), jnp.asarray(b2_row))


# ----------------------------------------------------------------------------
# Forward wrapper
# ----------------------------------------------------------------------------
@functools.partial(jax.jit,
                   static_argnames=("compute_dtype", "out_dtype", "m_block_rows"))
def basic_block_forward(x_nchw, w1_full, b1_row, w2_full, b2_row,
                        compute_dtype=jnp.float32, out_dtype=jnp.float32,
                        m_block_rows=None):
    """BasicBlock forward.  NCHW in / NCHW out, matching the PyTorch module."""
    N, Cin, H, W = x_nchw.shape
    Cout = b1_row.shape[-1] // W
    assert w1_full.shape == (W * Cin, 4 * W * Cout), w1_full.shape
    assert w2_full.shape == (W * Cout, 3 * W * Cout), w2_full.shape

    # NCHW -> row slab (N*H, W*Cin); lane axis = w*Cin + ci.  No spatial zero
    # padding is materialised anywhere.
    M_total = N * H
    x_rows = jnp.transpose(x_nchw, (0, 2, 3, 1)).reshape(M_total, W * Cin)
    x_rows = x_rows.astype(compute_dtype)

    # Rows per grid step: fill the MXU M dimension (~256 rows for v6e/v7x;
    # pass m_block_rows=128 when targeting v5e).  Always a multiple of H so
    # image boundaries stay block-internal for the row masks.
    if m_block_rows is None:
        m_blk = max(1, 256 // H) * H
    else:
        m_blk = max(H, (int(m_block_rows) // H) * H)
    m_blk = min(m_blk, M_total)
    if m_blk < M_total:
        # (8,128) rule: a tiled row axis must be sublane aligned.
        step = H * 8 // math.gcd(H, 8)
        m_blk = min(M_total, ((m_blk + step - 1) // step) * step)
    n_blocks = -(-M_total // m_blk)
    M_pad = n_blocks * m_blk
    if M_pad != M_total:
        x_rows = jnp.pad(x_rows, ((0, M_pad - M_total), (0, 0)))

    w1c = w1_full.astype(compute_dtype)
    w2c = w2_full.astype(compute_dtype)

    c_sz = np.dtype(compute_dtype).itemsize
    o_sz = np.dtype(out_dtype).itemsize
    block_bytes = (2 * m_blk * W * Cin * c_sz           # double-buffered input
                   + 2 * m_blk * W * Cout * o_sz        # double-buffered output
                   + 2 * (w1c.size + w2c.size) * c_sz   # resident banded weights
                   + 2 * (b1_row.size + b2_row.size) * 4)
    vmem_limit = int(min(32 * 1024 * 1024,
                         max(8 * 1024 * 1024, 2 * block_bytes)))

    flops = 2 * M_pad * (W * Cin * 4 * W * Cout + W * Cout * 3 * W * Cout)
    bytes_accessed = int(x_rows.size * c_sz + M_pad * W * Cout * o_sz
                         + (w1c.size + w2c.size) * c_sz
                         + (b1_row.size + b2_row.size) * 4)

    out_rows = pl.pallas_call(
        functools.partial(_basic_block_kernel, H=H),
        out_shape=jax.ShapeDtypeStruct((M_pad, W * Cout), out_dtype),
        grid=(n_blocks,),
        in_specs=[
            pl.BlockSpec((m_blk, W * Cin), lambda i: (i, 0)),
            pl.BlockSpec((W * Cin, 4 * W * Cout), lambda i: (0, 0)),
            pl.BlockSpec((1, W * Cout), lambda i: (0, 0)),
            pl.BlockSpec((W * Cout, 3 * W * Cout), lambda i: (0, 0)),
            pl.BlockSpec((1, W * Cout), lambda i: (0, 0)),
        ],
        out_specs=pl.BlockSpec((m_blk, W * Cout), lambda i: (i, 0)),
        compiler_params=pltpu.CompilerParams(
            dimension_semantics=("parallel",),
            vmem_limit_bytes=vmem_limit),
        cost_estimate=pl.CostEstimate(flops=flops, transcendentals=0,
                                      bytes_accessed=bytes_accessed),
    )(x_rows, w1c, b1_row, w2c, b2_row)

    out = out_rows[:M_total].reshape(N, H, W, Cout)
    return jnp.transpose(out, (0, 3, 1, 2))


# ----------------------------------------------------------------------------
# Pure-JAX reference and self-test
# ----------------------------------------------------------------------------
def _reference_forward(x_nchw, w1, b1, w2, b2, ws):
    """Pure-JAX reference mirroring the PyTorch forward (NCHW convs)."""
    dn = ("NCHW", "OIHW", "NCHW")
    cout = w1.shape[0]
    h = lax.conv_general_dilated(x_nchw, w1, (1, 1), "SAME",
                                 dimension_numbers=dn)
    h = jnp.maximum(h + b1.reshape(1, cout, 1, 1), 0.0)
    y = lax.conv_general_dilated(h, w2, (1, 1), "SAME", dimension_numbers=dn)
    y = y + b2.reshape(1, cout, 1, 1)
    identity = lax.conv_general_dilated(x_nchw, ws, (1, 1), "VALID",
                                        dimension_numbers=dn)
    return jnp.maximum(y + identity, 0.0)


if __name__ == "__main__":
    # Small shapes: batch=2, in_channels=4, out_channels=8, spatial 16x16.
    N, Cin, Cout, H, W = 2, 4, 8, 16, 16

    key = jax.random.PRNGKey(0)
    kx, k1, kb1, k2, kb2, ks = jax.random.split(key, 6)
    x = jax.random.normal(kx, (N, Cin, H, W), dtype=jnp.float32)
    w1 = 0.1 * jax.random.normal(k1, (Cout, Cin, 3, 3), dtype=jnp.float32)
    b1 = 0.1 * jax.random.normal(kb1, (Cout,), dtype=jnp.float32)
    w2 = 0.1 * jax.random.normal(k2, (Cout, Cout, 3, 3), dtype=jnp.float32)
    b2 = 0.1 * jax.random.normal(kb2, (Cout,), dtype=jnp.float32)
    ws = 0.1 * jax.random.normal(ks, (Cout, Cin, 1, 1), dtype=jnp.float32)

    # One-time weight repack, hoisted out of the jitted forward.
    params = pack_basic_block_params(w1, b1, w2, b2, ws, W)

    ref = _reference_forward(x, w1, b1, w2, b2, ws)

    # f32 MXU operands: strict numerical match with the PyTorch forward.
    out = jax.block_until_ready(basic_block_forward(x, *params))
    assert out.shape == (N, Cout, H, W), out.shape
    err_f32 = float(jnp.max(jnp.abs(out - ref)))
    assert err_f32 < 2e-3, err_f32

    # bf16 MXU operands (fast path on v5e/v6e/v7x); f32 accumulation & rolls.
    out_bf16 = jax.block_until_ready(
        basic_block_forward(x, *params, compute_dtype=jnp.bfloat16))
    err_bf16 = float(jnp.max(jnp.abs(out_bf16 - ref)))
    assert err_bf16 < 0.25, err_bf16

    print("KERNEL_OK")
</pallas_src>

<mosaic_0001>
module attributes {stable_mosaic.version = 11 : i64} {
  func.func @_basic_block_kernel(%arg0: i32, %arg1: memref<32x64xf32, #tpu.memory_space<vmem>>, %arg2: memref<64x512xf32, #tpu.memory_space<vmem>>, %arg3: memref<1x128xf32, #tpu.memory_space<vmem>>, %arg4: memref<128x384xf32, #tpu.memory_space<vmem>>, %arg5: memref<1x128xf32, #tpu.memory_space<vmem>>, %arg6: memref<32x128xf32, #tpu.memory_space<vmem>>) attributes {dimension_semantics = [#tpu.dimension_semantics<parallel>], iteration_bounds = array<i64: 1>, scalar_prefetch = 0 : i64, scratch_operands = 0 : i64, tpu.core_type = #tpu.core_type<tc>, window_params = [{transform_indices = @transform_0, window_bounds = array<i64: 32, 64>}, {pipeline_mode = #tpu.pipeline_mode<synchronous>, transform_indices = @transform_1, window_bounds = array<i64: 64, 512>}, {pipeline_mode = #tpu.pipeline_mode<synchronous>, transform_indices = @transform_2, window_bounds = array<i64: 1, 128>}, {pipeline_mode = #tpu.pipeline_mode<synchronous>, transform_indices = @transform_3, window_bounds = array<i64: 128, 384>}, {pipeline_mode = #tpu.pipeline_mode<synchronous>, transform_indices = @transform_4, window_bounds = array<i64: 1, 128>}, {transform_indices = @transform_5, window_bounds = array<i64: 32, 128>}]} {
    %0 = tpu.iota {dimensions = array<i32: 0>} : vector<32x1xi32>
    %c16_i32 = arith.constant 16 : i32
    %c0_i32 = arith.constant 0 : i32
    %1 = arith.cmpi eq, %c16_i32, %c0_i32 : i32
    %c1_i32 = arith.constant 1 : i32
    %2 = arith.select %1, %c1_i32, %c16_i32 : i32
    %3 = vector.broadcast %2 : i32 to vector<32x1xi32>
    %4 = arith.remsi %0, %3 : vector<32x1xi32>
    %c0_i32_0 = arith.constant 0 : i32
    %5 = vector.broadcast %c0_i32_0 : i32 to vector<32x1xi32>
    %6 = arith.cmpi ne, %4, %5 : vector<32x1xi32>
    %c0_i32_1 = arith.constant 0 : i32
    %7 = vector.broadcast %c0_i32_1 : i32 to vector<32x1xi32>
    %8 = arith.cmpi slt, %4, %7 : vector<32x1xi32>
    %c0_i32_2 = arith.constant 0 : i32
    %9 = arith.cmpi slt, %2, %c0_i32_2 : i32
    %10 = vector.broadcast %9 : i1 to vector<32x1xi1>
    %11 = vector.broadcast %10 : vector<32x1xi1> to vector<32x1xi1>
    %12 = arith.xori %8, %11 : vector<32x1xi1>
    %13 = arith.andi %12, %6 : vector<32x1xi1>
    %14 = vector.broadcast %2 : i32 to vector<32x1xi32>
    %15 = arith.addi %4, %14 : vector<32x1xi32>
    %16 = arith.select %13, %15, %4 : vector<32x1xi1>, vector<32x1xi32>
    %c0_i32_3 = arith.constant 0 : i32
    %17 = vector.broadcast %c0_i32_3 : i32 to vector<32x1xi32>
    %18 = arith.cmpi ne, %16, %17 : vector<32x1xi32>
    %c15_i32 = arith.constant 15 : i32
    %19 = vector.broadcast %c15_i32 : i32 to vector<32x1xi32>
    %20 = arith.cmpi ne, %16, %19 : vector<32x1xi32>
    %c0 = arith.constant 0 : index
    %c0_4 = arith.constant 0 : index
    %21 = vector.load %arg1[%c0, %c0_4] : memref<32x64xf32, #tpu.memory_space<vmem>>, vector<32x64xf32>
    %c0_5 = arith.constant 0 : index
    %c0_6 = arith.constant 0 : index
    %22 = vector.load %arg2[%c0_5, %c0_6] : memref<64x512xf32, #tpu.memory_space<vmem>>, vector<64x512xf32>
    %cst = arith.constant dense<0.000000e+00> : vector<32x512xf32>
    %23 = tpu.matmul %21, %22, %cst {dimension_numbers = #tpu.dot_dimension_numbers<[1], [0], [0], [1], [0, 0, 1, 1], [], []>} : vector<32x64xf32>, vector<64x512xf32>, vector<32x512xf32> -> vector<32x512xf32>
    %24 = vector.extract_strided_slice %23 {offsets = [0, 384], sizes = [32, 128], strides = [1, 1]} : vector<32x512xf32> to vector<32x128xf32>
    %25 = vector.extract_strided_slice %23 {offsets = [0, 0], sizes = [32, 384], strides = [1, 1]} : vector<32x512xf32> to vector<32x384xf32>
    %26 = vector.extract_strided_slice %25 {offsets = [0, 0], sizes = [32, 128], strides = [1, 1]} : vector<32x384xf32> to vector<32x128xf32>
    %c1_i32_7 = arith.constant 1 : i32
    %27 = tpu.dynamic_rotate %26 by %c1_i32_7 dim 0 : vector<32x128xf32>, i32 -> vector<32x128xf32>
    %28 = vector.extract_strided_slice %25 {offsets = [0, 256], sizes = [32, 128], strides = [1, 1]} : vector<32x384xf32> to vector<32x128xf32>
    %c31_i32 = arith.constant 31 : i32
    %29 = tpu.dynamic_rotate %28 by %c31_i32 dim 0 : vector<32x128xf32>, i32 -> vector<32x128xf32>
    %cst_8 = arith.constant 0.000000e+00 : f32
    %30 = vector.shape_cast %18 : vector<32x1xi1> to vector<32x1xi1>
    %31 = vector.broadcast %30 : vector<32x1xi1> to vector<32x128xi1>
    %32 = vector.broadcast %cst_8 : f32 to vector<32x128xf32>
    %33 = arith.select %31, %27, %32 : vector<32x128xi1>, vector<32x128xf32>
    %34 = vector.extract_strided_slice %25 {offsets = [0, 128], sizes = [32, 128], strides = [1, 1]} : vector<32x384xf32> to vector<32x128xf32>
    %35 = arith.addf %33, %34 : vector<32x128xf32>
    %cst_9 = arith.constant 0.000000e+00 : f32
    %36 = vector.shape_cast %20 : vector<32x1xi1> to vector<32x1xi1>
    %37 = vector.broadcast %36 : vector<32x1xi1> to vector<32x128xi1>
    %38 = vector.broadcast %cst_9 : f32 to vector<32x128xf32>
    %39 = arith.select %37, %29, %38 : vector<32x128xi1>, vector<32x128xf32>
    %40 = arith.addf %35, %39 : vector<32x128xf32>
    %c0_10 = arith.constant 0 : index
    %c0_11 = arith.constant 0 : index
    %41 = vector.load %arg3[%c0_10, %c0_11] : memref<1x128xf32, #tpu.memory_space<vmem>>, vector<1x128xf32>
    %42 = vector.broadcast %41 : vector<1x128xf32> to vector<32x128xf32>
    %43 = arith.addf %40, %42 : vector<32x128xf32>
    %cst_12 = arith.constant 0.000000e+00 : f32
    %44 = vector.broadcast %cst_12 : f32 to vector<32x128xf32>
    %45 = arith.maximumf %43, %44 : vector<32x128xf32>
    %c0_13 = arith.constant 0 : index
    %c0_14 = arith.constant 0 : index
    %46 = vector.load %arg4[%c0_13, %c0_14] : memref<128x384xf32, #tpu.memory_space<vmem>>, vector<128x384xf32>
    %cst_15 = arith.constant dense<0.000000e+00> : vector<32x384xf32>
    %47 = tpu.matmul %45, %46, %cst_15 {dimension_numbers = #tpu.dot_dimension_numbers<[1], [0], [0], [1], [0, 0, 1, 1], [], []>} : vector<32x128xf32>, vector<128x384xf32>, vector<32x384xf32> -> vector<32x384xf32>
    %48 = vector.extract_strided_slice %47 {offsets = [0, 0], sizes = [32, 128], strides = [1, 1]} : vector<32x384xf32> to vector<32x128xf32>
    %c1_i32_16 = arith.constant 1 : i32
    %49 = tpu.dynamic_rotate %48 by %c1_i32_16 dim 0 : vector<32x128xf32>, i32 -> vector<32x128xf32>
    %50 = vector.extract_strided_slice %47 {offsets = [0, 256], sizes = [32, 128], strides = [1, 1]} : vector<32x384xf32> to vector<32x128xf32>
    %c31_i32_17 = arith.constant 31 : i32
    %51 = tpu.dynamic_rotate %50 by %c31_i32_17 dim 0 : vector<32x128xf32>, i32 -> vector<32x128xf32>
    %cst_18 = arith.constant 0.000000e+00 : f32
    %52 = vector.shape_cast %18 : vector<32x1xi1> to vector<32x1xi1>
    %53 = vector.broadcast %52 : vector<32x1xi1> to vector<32x128xi1>
    %54 = vector.broadcast %cst_18 : f32 to vector<32x128xf32>
    %55 = arith.select %53, %49, %54 : vector<32x128xi1>, vector<32x128xf32>
    %56 = vector.extract_strided_slice %47 {offsets = [0, 128], sizes = [32, 128], strides = [1, 1]} : vector<32x384xf32> to vector<32x128xf32>
    %57 = arith.addf %55, %56 : vector<32x128xf32>
    %cst_19 = arith.constant 0.000000e+00 : f32
    %58 = vector.shape_cast %20 : vector<32x1xi1> to vector<32x1xi1>
    %59 = vector.broadcast %58 : vector<32x1xi1> to vector<32x128xi1>
    %60 = vector.broadcast %cst_19 : f32 to vector<32x128xf32>
    %61 = arith.select %59, %51, %60 : vector<32x128xi1>, vector<32x128xf32>
    %62 = arith.addf %57, %61 : vector<32x128xf32>
    %c0_20 = arith.constant 0 : index
    %c0_21 = arith.constant 0 : index
    %63 = vector.load %arg5[%c0_20, %c0_21] : memref<1x128xf32, #tpu.memory_space<vmem>>, vector<1x128xf32>
    %64 = vector.broadcast %63 : vector<1x128xf32> to vector<32x128xf32>
    %65 = arith.addf %62, %64 : vector<32x128xf32>
    %66 = arith.addf %65, %24 : vector<32x128xf32>
    %cst_22 = arith.constant 0.000000e+00 : f32
    %67 = vector.broadcast %cst_22 : f32 to vector<32x128xf32>
    %68 = arith.maximumf %66, %67 : vector<32x128xf32>
    %c0_23 = arith.constant 0 : index
    %c0_24 = arith.constant 0 : index
    %69 = vector.load %arg6[%c0_23, %c0_24] : memref<32x128xf32, #tpu.memory_space<vmem>>, vector<32x128xf32>
    tpu.vector_store %arg6[%c0_23, %c0_24], %68 {strides = array<i32>} : memref<32x128xf32, #tpu.memory_space<vmem>>, vector<32x128xf32>,
    return
  }
  func.func @transform_0(%arg0: i32) -> (i32, i32) {
    %c0_i32 = arith.constant 0 : i32
    %c0_i32_0 = arith.constant 0 : i32
    return %arg0, %c0_i32 : i32, i32
  }
  func.func @transform_1(%arg0: i32) -> (i32, i32) {
    %c0_i32 = arith.constant 0 : i32
    %c0_i32_0 = arith.constant 0 : i32
    %c0_i32_1 = arith.constant 0 : i32
    return %c0_i32, %c0_i32_0 : i32, i32
  }
  func.func @transform_2(%arg0: i32) -> (i32, i32) {
    %c0_i32 = arith.constant 0 : i32
    %c0_i32_0 = arith.constant 0 : i32
    %c0_i32_1 = arith.constant 0 : i32
    return %c0_i32, %c0_i32_0 : i32, i32
  }
  func.func @transform_3(%arg0: i32) -> (i32, i32) {
    %c0_i32 = arith.constant 0 : i32
    %c0_i32_0 = arith.constant 0 : i32
    %c0_i32_1 = arith.constant 0 : i32
    return %c0_i32, %c0_i32_0 : i32, i32
  }
  func.func @transform_4(%arg0: i32) -> (i32, i32) {
    %c0_i32 = arith.constant 0 : i32
    %c0_i32_0 = arith.constant 0 : i32
    %c0_i32_1 = arith.constant 0 : i32
    return %c0_i32, %c0_i32_0 : i32, i32
  }
  func.func @transform_5(%arg0: i32) -> (i32, i32) {
    %c0_i32 = arith.constant 0 : i32
    %c0_i32_0 = arith.constant 0 : i32
    return %arg0, %c0_i32 : i32, i32
  }
}

</mosaic_0001>

<bundles_post_ra>
// kernel: basic_block_forward.1
= control target key start
LH: loop header
LB: loop body
LE: loop exit
PB: predicated region body
PF: predicated region fallthrough
CT: control target
= control target key end

     0   :  { %10 = vsyncpa [#allocation3], 0  ;;  %s861_s18 = smov [#allocation2]   ;;  %s1185_s0 = inlined_call_operand.vmem [shape: f32[32,64], index: 0, kind: input, shape index: {}]   ;;  %s1186_s1 = inlined_call_operand.hbm [shape: f32[64,512], index: 1, kind: input, shape index: {}]   ;;  %s1187_s2 = inlined_call_operand.vmem [shape: f32[1,128], index: 2, kind: input, shape index: {}]   ;;  %s1188_s3 = inlined_call_operand.vmem [shape: f32[128,384], index: 3, kind: input, shape index: {}]   ;;  %s1189_s4 = inlined_call_operand.vmem [shape: f32[1,128], index: 4, kind: input, shape index: {}]   ;;  %s1190_s5 = inlined_call_operand.vmem [shape: f32[32,128], index: 5, kind: output, shape index: {}]  }
   0x1   :  { %s18_s19 = sshll.u32 %s861_s18, 4  ;;  %s837_s22 = scalar_lea.hbm %s1186_s1, 4096  ;;  %s19_s19 = int_to_ptr.vmem [resolvable:$true] %s18_s19 }
   0x2   :  { %p838_p0 = scmp.ne.s32.totalorder %s1186_s1, %s837_s22  ;;  %p841_p1 = scmp.lt.u32.totalorder %s837_s22, %s1186_s1 }
   0x4   :  { %p843_p2 = pnand %p841_p1, %p838_p0 }
   0x6   :  { %846 = shalt.err (!%p843_p2)
}
   0x7   :  { %s847_s27 = scalar_lea.vmem %s19_s19, 4096  ;;  %p852_p4 = scmp.lt.s32.totalorder %s19_s19, %s19_s19 }
   0x8   :  { %p848_p3 = scmp.ne.s32.totalorder %s19_s19, %s847_s27  ;;  %p853_p5 = scmp.lt.s32.totalorder %s847_s27, %s847_s27 }
   0xa   :  { %p854_p6 = por %p853_p5, %p852_p4 }
   0xc   :  { %p855_p7 = pnand %p854_p6, %p848_p3 }
   0xe   :  { %858 = shalt.err (!%p855_p7)
}
   0xf   :  { %s862_s28 = smov 512   ;;  %s863_s29 = smov 32  }
  0x10   :  { %24 = dma.hbm_to_vmem [thread:$0]  %s1186_s1, 4096, %s19_s19, [#allocation3], %s862_s28, %s862_s28, %s863_s29  }
  0x11   :  { %859 = dma.done.wait [#allocation3], 4096  }
  0x12   :  { %860 = vsyncadd [#allocation3], 4294963200  ;;  %v864_v0 = vmov 0.0   ;;  %v100_v1 = vld [vmem:[#allocation2 + $0x8] sm:$0xff]  ;;  %v102_v3 = vld [vmem:[#allocation2 + $0x18] sm:$0xff]  ;;  %vm131_vm0 = vcmask 523264  }
  0x13   :  { %208 = vmatprep.mubr.f32.mxu0 %v864_v0  ;;  %297 = vmatprep.mubr.f32.mxu1 %v864_v0  ;;  %v104_v2 = vld [vmem:[#allocation2 + $0x28] sm:$0xff]  ;;  %v106_v5 = vld [vmem:[#allocation2 + $0x38] sm:$0xff]  ;;  %v99_v6 = vld [vmem:[#allocation2] sm:$0xff] }
  0x14   :  { %v737_v4 = vpack.c.bf16 %v104_v2, %v100_v1  ;;  %v103_v7 = vld [vmem:[#allocation2 + $0x20] sm:$0xff]  ;;  %v753_v8 = vpack.c.bf16 %v106_v5, %v102_v3  ;;  %v101_v10 = vld [vmem:[#allocation2 + $0x10] sm:$0xff]  ;;  %v108_v12 = vld [vmem:[#allocation2 + $0x48] sm:$0xff] }
  0x15   :  { %v739_v9 = vpack.c.bf16 %v103_v7, %v99_v6  ;;  %v105_v11 = vld [vmem:[#allocation2 + $0x30] sm:$0xff]  ;;  %v112_v14 = vld [vmem:[#allocation2 + $0x68] sm:$0xff]  ;;  %v110_v15 = vld [vmem:[#allocation2 + $0x58] sm:$0xff] }
  0x16   :  { %738 = vmatprep.subr.bf16.mxu0 %v737_v4  ;;  %v755_v13 = vpack.c.bf16 %v105_v11, %v101_v10  ;;  %v114_v16 = vld [vmem:[#allocation2 + $0x78] sm:$0xff]  ;;  %754 = vmatprep.subr.bf16.mxu1 %v753_v8  ;;  %v741_v17 = vpack.c.bf16 %v112_v14, %v108_v12  ;;  %v107_v19 = vld [vmem:[#allocation2 + $0x40] sm:$0xff]  ;;  %v109_v21 = vld [vmem:[#allocation2 + $0x50] sm:$0xff] }
  0x17   :  { %740 = vmatpush1.bf16.msra.mxu0 %v739_v9  ;;  %v757_v18 = vpack.c.bf16 %v114_v16, %v110_v15  ;;  %v111_v20 = vld [vmem:[#allocation2 + $0x60] sm:$0xff]  ;;  %v113_v23 = vld [vmem:[#allocation2 + $0x70] sm:$0xff]  ;;  %v116_v24 = vld [vmem:[#allocation2 + $0x88] sm:$0xff] }
  0x18   :  { %756 = vmatpush1.bf16.msra.mxu1 %v755_v13  ;;  %v743_v22 = vpack.c.bf16 %v111_v20, %v107_v19  ;;  %v120_v25 = vld [vmem:[#allocation2 + $0xa8] sm:$0xff]  ;;  %742 = vmatprep.subr.bf16.mxu0 %v741_v17  ;;  %v759_v26 = vpack.c.bf16 %v113_v23, %v109_v21  ;;  %v118_v28 = vld [vmem:[#allocation2 + $0x98] sm:$0xff]  ;;  %v115_v30 = vld [vmem:[#allocation2 + $0x80] sm:$0xff] }
  0x19   :  { %758 = vmatprep.subr.bf16.mxu1 %v757_v18  ;;  %v745_v27 = vpack.c.bf16 %v120_v25, %v116_v24  ;;  %v122_v29 = vld [vmem:[#allocation2 + $0xb8] sm:$0xff]  ;;  %v119_v32 = vld [vmem:[#allocation2 + $0xa0] sm:$0xff]  ;;  %v117_v33 = vld [vmem:[#allocation2 + $0x90] sm:$0xff] }
  0x1a   :  { %v761_v31 = vpack.c.bf16 %v122_v29, %v118_v28  ;;  %v121_v34 = vld [vmem:[#allocation2 + $0xb0] sm:$0xff]  ;;  %v747_v35 = vpack.c.bf16 %v119_v32, %v115_v30  ;;  %v124_v36 = vld [vmem:[#allocation2 + $0xc8] sm:$0xff]  ;;  %v126_v38 = vld [vmem:[#allocation2 + $0xd8] sm:$0xff] }
  0x1b   :  { %744 = vmatpush1.bf16.msra.mxu0 %v743_v22  ;;  %v128_v37 = vld [vmem:[#allocation2 + $0xe8] sm:$0xff]  ;;  %v763_v39 = vpack.c.bf16 %v121_v34, %v117_v33  ;;  %v130_v41 = vld [vmem:[#allocation2 + $0xf8] sm:$0xff]  ;;  %v123_v42 = vld [vmem:[#allocation2 + $0xc0] sm:$0xff] }
  0x1c   :  { %760 = vmatpush1.bf16.msra.mxu1 %v759_v26  ;;  %746 = vmatprep.subr.bf16.mxu0 %v745_v27  ;;  %v749_v40 = vpack.c.bf16 %v128_v37, %v124_v36  ;;  %v127_v43 = vld [vmem:[#allocation2 + $0xe0] sm:$0xff]  ;;  %v765_v44 = vpack.c.bf16 %v130_v41, %v126_v38  ;;  %v125_v45 = vld [vmem:[#allocation2 + $0xd0] sm:$0xff]  ;;  %v388_v48 = vld [vmem:[%s1188_s3 + $0x8] sm:$0xff] }
  0x1d   :  { %762 = vmatprep.subr.bf16.mxu1 %v761_v31  ;;  %v129_v46 = vld [vmem:[#allocation2 + $0xf0] sm:$0xff]  ;;  %v751_v47 = vpack.c.bf16 %v127_v43, %v123_v42  ;;  %v391_v49 = vld [vmem:[%s1188_s3 + $0x20] sm:$0xff]  ;;  %v392_v53 = vld [vmem:[%s1188_s3 + $0x28] sm:$0xff] }
  0x1e   :  { %v767_v50 = vpack.c.bf16 %v129_v46, %v125_v45  ;;  %v769_v51 = vpack.c.bf16 %v391_v49, %v388_v48  ;;  %v389_v52 = vld [vmem:[%s1188_s3 + $0x10] sm:$0xff]  ;;  %v387_v54 = vld [vmem:[%s1188_s3] sm:$0xff]  ;;  %v390_v55 = vld [vmem:[%s1188_s3 + $0x18] sm:$0xff] }
  0x1f   :  { %748 = vmatpush1.bf16.msra.mxu0 %v747_v35  ;;  %v801_v56 = vpack.c.bf16 %v392_v53, %v389_v52  ;;  %v394_v57 = vld [vmem:[%s1188_s3 + $0x38] sm:$0xff]  ;;  %v397_v58 = vld [vmem:[%s1188_s3 + $0x50] sm:$0xff]  ;;  %v95_v59 = vld [vmem:[%s1185_s0] sm:$0xff]  ;;  %v771_v62 = vpack.c.bf16 %v390_v55, %v387_v54 }
  0x20   :  { %764 = vmatpush1.bf16.msra.mxu1 %v763_v39  ;;  %750 = vmatprep.subr.bf16.mxu0 %v749_v40  ;;  %v395_v60 = vld [vmem:[%s1188_s3 + $0x40] sm:$0xff]  ;;  %v398_v61 = vld [vmem:[%s1188_s3 + $0x58] sm:$0xff]  ;;  %v773_v63 = vpack.c.bf16 %v397_v58, %v394_v57  ;;  %v393_v1 = vld [vmem:[%s1188_s3 + $0x30] sm:$0xff] }
  0x21   :  { %766 = vmatprep.subr.bf16.mxu1 %v765_v44  ;;  %v396_v2 = vld [vmem:[%s1188_s3 + $0x48] sm:$0xff]  ;;  %v805_v3 = vpack.c.bf16 %v398_v61, %v395_v60  ;;  %v97_v6 = vld [vmem:[%s1185_s0 + $0x10] sm:$0xff]  ;;  %v98_v7 = vld [vmem:[%s1185_s0 + $0x18] sm:$0xff] }
  0x22   :  { %v96_v4 = vld [vmem:[%s1185_s0 + $0x8] sm:$0xff]  ;;  %v775_v5 = vpack.c.bf16 %v396_v2, %v393_v1  ;;  %v403_v9 = vld [vmem:[%s1188_s3 + $0x80] sm:$0xff]  ;;  %v402_v12 = vld [vmem:[%s1188_s3 + $0x78] sm:$0xff] }
  0x23   :  { %752 = vmatpush1.bf16.msra.mxu0 %v751_v47  ;;  %v400_v8 = vld [vmem:[%s1188_s3 + $0x68] sm:$0xff]  ;;  %v399_v11 = vld [vmem:[%s1188_s3 + $0x60] sm:$0xff]  ;;  %v401_v13 = vld [vmem:[%s1188_s3 + $0x70] sm:$0xff] }
  0x24   :  { %768 = vmatpush1.bf16.msra.mxu1 %v767_v50  ;;  %770 = vmatprep.subr.bf16.mxu0 %v769_v51  ;;  %v777_v10 = vpack.c.bf16 %v403_v9, %v400_v8  ;;  %v779_v14 = vpack.c.bf16 %v402_v12, %v399_v11  ;;  %v404_v15 = vld [vmem:[%s1188_s3 + $0x88] sm:$0xff]  ;;  %v406_v17 = vld [vmem:[%s1188_s3 + $0x98] sm:$0xff]  ;;  %v409_v18 = vld [vmem:[%s1188_s3 + $0xb0] sm:$0xff] }
  0x25   :  { %802 = vmatprep.subr.bf16.mxu1 %v801_v56  ;;  %v809_v16 = vpack.c.bf16 %v404_v15, %v401_v13  ;;  %v781_v19 = vpack.c.bf16 %v409_v18, %v406_v17  ;;  %v405_v20 = vld [vmem:[%s1188_s3 + $0x90] sm:$0xff]  ;;  %v408_v21 = vld [vmem:[%s1188_s3 + $0xa8] sm:$0xff]  ;;  %v407_v22 = vld [vmem:[%s1188_s3 + $0xa0] sm:$0xff] }
  0x26   :  { %669 = vmatmul.mubr.msk.f32.vlgmr.msra.gmra.mrb[0].mxu0 %vm131_vm0, %v95_v59  ;;  %v783_v23 = vpack.c.bf16 %v408_v21, %v405_v20  ;;  %v410_v24 = vld [vmem:[%s1188_s3 + $0xb8] sm:$0xff]  ;;  %v412_v26 = vld [vmem:[%s1188_s3 + $0xc8] sm:$0xff]  ;;  %v415_v27 = vld [vmem:[%s1188_s3 + $0xe0] sm:$0xff] }
  0x27   :  { %673 = vmatmul.mubr.msk.f32.vlgmr.msra.gmra.mrb[0].mxu1 %vm131_vm0, %v95_v59  ;;  %214 = vmatprep.mubr.f32.mxu0 %v864_v0  ;;  %v813_v25 = vpack.c.bf16 %v410_v24, %v407_v22  ;;  %v785_v28 = vpack.c.bf16 %v415_v27, %v412_v26  ;;  %v411_v29 = vld [vmem:[%s1188_s3 + $0xc0] sm:$0xff]  ;;  %v414_v30 = vld [vmem:[%s1188_s3 + $0xd8] sm:$0xff]  ;;  %v413_v31 = vld [vmem:[%s1188_s3 + $0xd0] sm:$0xff] }
  0x28   :  { %303 = vmatprep.mubr.f32.mxu1 %v864_v0  ;;  %772 = vmatpush1.bf16.msra.mxu0 %v771_v62  ;;  %v787_v32 = vpack.c.bf16 %v414_v30, %v411_v29  ;;  %v416_v33 = vld [vmem:[%s1188_s3 + $0xe8] sm:$0xff]  ;;  %v418_v35 = vld [vmem:[%s1188_s3 + $0xf8] sm:$0xff]  ;;  %v421_v36 = vld [vmem:[%s1188_s3 + $0x110] sm:$0xff]  ;;  %v34_v62 = vlaneseq }
  0x29   :  { %804 = vmatpush3.bf16.msra.mxu1 %v801_v56  ;;  %774 = vmatprep.subr.bf16.mxu0 %v773_v63  ;;  %v817_v34 = vpack.c.bf16 %v416_v33, %v413_v31  ;;  %v789_v37 = vpack.c.bf16 %v421_v36, %v418_v35  ;;  %v417_v38 = vld [vmem:[%s1188_s3 + $0xf0] sm:$0xff]  ;;  %v420_v39 = vld [vmem:[%s1188_s3 + $0x108] sm:$0xff]  ;;  %v419_v40 = vld [vmem:[%s1188_s3 + $0x100] sm:$0xff] }
  0x2a   :  { %670 = vmatmul.mubr.msk.f32.gmra.mrb[2].mxu0 %vm131_vm0, %v96_v4  ;;  %806 = vmatprep.subr.bf16.mxu1 %v805_v3  ;;  %v791_v41 = vpack.c.bf16 %v420_v39, %v417_v38  ;;  %v422_v42 = vld [vmem:[%s1188_s3 + $0x118] sm:$0xff]  ;;  %v424_v44 = vld [vmem:[%s1188_s3 + $0x128] sm:$0xff]  ;;  %v427_v45 = vld [vmem:[%s1188_s3 + $0x140] sm:$0xff]  ;;  %v1080_v63 = vshrl.u32 %v34_v62, 7 }
  0x2b   :  { %674 = vmatmul.mubr.msk.f32.gmra.mrb[2].mxu1 %vm131_vm0, %v96_v4  ;;  %220 = vmatprep.mubr.f32.mxu0 %v864_v0  ;;  %v821_v43 = vpack.c.bf16 %v422_v42, %v419_v40  ;;  %v793_v46 = vpack.c.bf16 %v427_v45, %v424_v44  ;;  %v423_v47 = vld [vmem:[%s1188_s3 + $0x120] sm:$0xff]  ;;  %v426_v48 = vld [vmem:[%s1188_s3 + $0x138] sm:$0xff]  ;;  %v425_v49 = vld [vmem:[%s1188_s3 + $0x130] sm:$0xff] }
  0x2c   :  { %309 = vmatprep.mubr.f32.mxu1 %v864_v0  ;;  %776 = vmatpush1.bf16.msra.mxu0 %v775_v5  ;;  %v795_v50 = vpack.c.bf16 %v426_v48, %v423_v47  ;;  %v428_v51 = vld [vmem:[%s1188_s3 + $0x148] sm:$0xff]  ;;  %v430_v53 = vld [vmem:[%s1188_s3 + $0x158] sm:$0xff]  ;;  %v433_v54 = vld [vmem:[%s1188_s3 + $0x170] sm:$0xff]  ;;  %v37_v4 = vadd.s32 16, %v1080_v63  ;;  %vm326_vm1 = vcmp.lt.s32.totalorder %v1080_v63, 1  ;;  %v38_v17 = vadd.s32 24, %v1080_v63 }
  0x2d   :  { %808 = vmatpush3.bf16.msra.mxu1 %v805_v3  ;;  %778 = vmatprep.subr.bf16.mxu0 %v777_v10  ;;  %v825_v52 = vpack.c.bf16 %v428_v51, %v425_v49  ;;  %v797_v55 = vpack.c.bf16 %v433_v54, %v430_v53  ;;  %v429_v56 = vld [vmem:[%s1188_s3 + $0x150] sm:$0xff]  ;;  %v432_v57 = vld [vmem:[%s1188_s3 + $0x168] sm:$0xff]  ;;  %v431_v58 = vld [vmem:[%s1188_s3 + $0x160] sm:$0xff]  ;;  %vm335_vm2 = vcmp.lt.s32.totalorder %v1080_v63, 7  ;;  %v43_v26 = vand.u32 15, %v1080_v63 }
  0x2e   :  { %671 = vmatmul.mubr.msk.f32.gmra.mrb[4].mxu0 %vm131_vm0, %v97_v6  ;;  %810 = vmatprep.subr.bf16.mxu1 %v809_v16  ;;  %v799_v59 = vpack.c.bf16 %v432_v57, %v429_v56  ;;  %v434_v60 = vld [vmem:[%s1188_s3 + $0x178] sm:$0xff]  ;;  %v57_v13 = vand.u32 15, %v37_v4  ;;  %v64_v30 = vand.u32 15, %v38_v17 }
  0x2f   :  { %675 = vmatmul.mubr.msk.f32.gmra.mrb[4].mxu1 %vm131_vm0, %v97_v6  ;;  %226 = vmatprep.mubr.f32.mxu0 %v864_v0  ;;  %v829_v61 = vpack.c.bf16 %v434_v60, %v431_v58  ;;  %v36_v6 = vadd.s32 8, %v1080_v63  ;;  %vm1114_vm5 = vcmp.ne.s32.totalorder %v43_v26, 0 }
  0x30   :  { %315 = vmatprep.mubr.f32.mxu1 %v864_v0  ;;  %780 = vmatpush1.bf16.msra.mxu0 %v779_v14  ;;  %vm1095_vm3 = vcmp.ne.s32.totalorder %v57_v13, 0  ;;  %vm1118_vm6 = vcmp.ne.s32.totalorder %v64_v30, 15 }
  0x31   :  { %812 = vmatpush3.bf16.msra.mxu1 %v809_v16  ;;  %782 = vmatprep.subr.bf16.mxu0 %v781_v19  ;;  %v50_v16 = vand.u32 15, %v36_v6 }
  0x32   :  { %672 = vmatmul.mubr.msk.f32.gmra.mrb[6].mxu0 %vm131_vm0, %v98_v7  ;;  %814 = vmatprep.subr.bf16.mxu1 %v813_v25 }
  0x33   :  { %676 = vmatmul.mubr.msk.f32.gmra.mrb[6].mxu1 %vm131_vm0, %v98_v7  ;;  %499 = vmatprep.mubr.f32.mxu0 %v864_v0  ;;  %vm1100_vm4 = vcmp.ne.s32.totalorder %v50_v16, 15 }
  0x34   :  { %784 = vmatpush1.bf16.msra.mxu0 %v783_v23 }
  0x35   :  { %816 = vmatpush3.bf16.msra.mxu1 %v813_v25  ;;  %786 = vmatprep.subr.bf16.mxu0 %v785_v28 }
  0x36   :  { %818 = vmatprep.subr.bf16.mxu1 %v817_v34 }
  0x38   :  { %788 = vmatpush1.bf16.msra.mxu0 %v787_v32 }
  0x39   :  { %820 = vmatpush3.bf16.msra.mxu1 %v817_v34  ;;  %790 = vmatprep.subr.bf16.mxu0 %v789_v37 }
  0x3a   :  { %822 = vmatprep.subr.bf16.mxu1 %v821_v43 }
  0x3c   :  { %792 = vmatpush1.bf16.msra.mxu0 %v791_v41 }
  0x3d   :  { %824 = vmatpush3.bf16.msra.mxu1 %v821_v43  ;;  %794 = vmatprep.subr.bf16.mxu0 %v793_v46 }
  0x3e   :  { %826 = vmatprep.subr.bf16.mxu1 %v825_v52 }
  0x40   :  { %796 = vmatpush1.bf16.msra.mxu0 %v795_v50  ;;  %v677_v50 = vld [vmem:[%s1187_s2] ss:$0 sm:$0xff] }
  0x41   :  { %828 = vmatpush3.bf16.msra.mxu1 %v825_v52  ;;  %798 = vmatprep.subr.bf16.mxu0 %v797_v55 }
  0x42   :  { %830 = vmatprep.subr.bf16.mxu1 %v829_v61 }
  0x44   :  { %800 = vmatpush1.bf16.msra.mxu0 %v799_v59 }
  0x45   :  { %832 = vmatpush3.bf16.msra.mxu1 %v829_v61 }
  0xf9   :  { %v210_v1 = vpop.f32.mrb[0].mxu0 }
  0xfa   :  { %v212_v2 = vpop.f32.mrb[1].mxu0  ;;  %v299_v3 = vpop.f32.mrb[0].mxu1  ;;  %v322_v9 = vrot.slane %v210_v1, 7 }
  0xfb   :  { %v1083_v5 = vpop.f32.mrb[1].mxu1  ;;  %v331_v8 = vrot.slane %v299_v3, 1 }
  0xfd   :  { %v216_v7 = vpop.f32.mrb[2].mxu0 }
  0xfe   :  { %v323_v10 = vrot.slane %v216_v7, 7  ;;  %v218_v11 = vpop.f32.mrb[3].mxu0  ;;  %v305_v12 = vpop.f32.mrb[2].mxu1 }
  0xff   :  { %v332_v14 = vrot.slane %v305_v12, 1  ;;  %v1087_v15 = vpop.f32.mrb[3].mxu1 }
 0x100   :  { %v329_v18 = vsel %vm326_vm1, %v322_v9, %v323_v10 }
 0x101   :  { %v353_v19 = vadd.f32 %v329_v18, %v218_v11  ;;  %v338_v20 = vsel %vm335_vm2, %v331_v8, %v332_v14  ;;  %v222_v21 = vpop.f32.mrb[4].mxu0 }
 0x102   :  { %v324_v22 = vrot.slane %v222_v21, 7  ;;  %v311_v23 = vpop.f32.mrb[4].mxu1  ;;  %v224_v25 = vpop.f32.mrb[5].mxu0 }
 0x103   :  { %v333_v28 = vrot.slane %v311_v23, 1  ;;  %v1104_v29 = vpop.f32.mrb[5].mxu1 }
 0x104   :  { %v328_v31 = vsel %vm326_vm1, %v323_v10, %v324_v22 }
 0x105   :  { %v337_v32 = vsel %vm335_vm2, %v332_v14, %v333_v28  ;;  %v350_v33 = vsel %vm1095_vm3, %v328_v31, 0.0  ;;  %v228_v34 = vpop.f32.mrb[6].mxu0  ;;  %v678_v31 = vld [vmem:[%s1189_s4] ss:$0 sm:$0xff] }
 0x106   :  { %v365_v35 = vsel %vm1100_vm4, %v337_v32, 0.0  ;;  %v354_v36 = vadd.f32 %v350_v33, %v224_v25  ;;  %v325_v38 = vrot.slane %v228_v34, 7  ;;  %v317_v39 = vpop.f32.mrb[6].mxu1  ;;  %v230_v40 = vpop.f32.mrb[7].mxu0 }
 0x107   :  { %v369_v41 = vadd.f32 %v365_v35, %v353_v19  ;;  %v334_v42 = vrot.slane %v317_v39, 1  ;;  %v1122_v44 = vpop.f32.mrb[7].mxu1 }
 0x108   :  { %v330_v45 = vsel %vm326_vm1, %v325_v38, %v322_v9  ;;  %v327_v46 = vsel %vm326_vm1, %v324_v22, %v325_v38 }
 0x109   :  { %v348_v47 = vsel %vm1114_vm5, %v330_v45, 0.0  ;;  %v336_v48 = vsel %vm335_vm2, %v333_v28, %v334_v42  ;;  %v339_v49 = vsel %vm335_vm2, %v334_v42, %v331_v8  ;;  %v355_v53 = vadd.f32 %v327_v46, %v230_v40 }
 0x10a   :  { %v352_v51 = vadd.f32 %v348_v47, %v212_v2  ;;  %v370_v52 = vadd.f32 %v354_v36, %v336_v48  ;;  %v367_v54 = vsel %vm1118_vm6, %v339_v49, 0.0  ;;  %v380_v57 = vadd.f32 %v677_v50, %v369_v41 }
 0x10b   :  { %v371_v56 = vadd.f32 %v367_v54, %v355_v53 }
 0x10c   :  { %v368_v55 = vadd.f32 %v352_v51, %v338_v20  ;;  %v381_v59 = vadd.f32 %v677_v50, %v370_v52  ;;  %v384_v61 = vmax.f32 %v380_v57, 0.0 }
 0x10d   :  { %v382_v62 = vadd.f32 %v677_v50, %v371_v56 }
 0x10e   :  { %v379_v58 = vadd.f32 %v677_v50, %v368_v55  ;;  %v385_v1 = vmax.f32 %v381_v59, 0.0 }
 0x10f   :  { %v386_v2 = vmax.f32 %v382_v62, 0.0 }
 0x110   :  { %v383_v60 = vmax.f32 %v379_v58, 0.0 }
 0x112   :  { %500 = vmatmul.mubr.f32.vlgmr.msra.gmra.mrb[8].mxu0 %v383_v60  ;;  %731 = vmatprep.mubr.f32.mxu1 %v383_v60 }
 0x113   :  { %732 = vmatmul.mubr.f32.vlgmr.msra.gmra.mrb[8].mxu1 %v384_v61  ;;  %505 = vmatprep.mubr.f32.mxu0 %v864_v0 }
 0x114   :  { %734 = vmatprep.mubr.f32.mxu1 %v385_v1 }
 0x116   :  { %506 = vmatmul.mubr.f32.gmra.mrb[10].mxu0 %v384_v61 }
 0x117   :  { %735 = vmatmul.mubr.f32.gmra.mrb[10].mxu1 %v386_v2  ;;  %511 = vmatprep.mubr.f32.mxu0 %v864_v0 }
 0x11a   :  { %512 = vmatmul.mubr.f32.gmra.mrb[12].mxu0 %v385_v1 }
 0x11b   :  { %517 = vmatprep.mubr.f32.mxu0 %v864_v0 }
 0x11e   :  { %518 = vmatmul.mubr.f32.gmra.mrb[14].mxu0 %v386_v2 }
 0x1e5   :  { %v501_v3 = vpop.f32.mrb[8].mxu0 }
 0x1e6   :  { %v503_v4 = vpop.f32.mrb[9].mxu0  ;;  %v733_v6 = vpop.f32.mrb[8].mxu1  ;;  %v609_v11 = vrot.slane %v501_v3, 7 }
 0x1e7   :  { %v618_v7 = vrot.slane %v733_v6, 1  ;;  %v590_v8 = vpop.f32.mrb[9].mxu1 }
 0x1e8   :  { %v617_v9 = vrot.slane %v590_v8, 1 }
 0x1e9   :  { %v507_v10 = vpop.f32.mrb[10].mxu0 }
 0x1ea   :  { %v623_v12 = vsel %vm335_vm2, %v617_v9, %v618_v7  ;;  %v610_v13 = vrot.slane %v507_v10, 7  ;;  %v509_v14 = vpop.f32.mrb[11].mxu0  ;;  %v736_v16 = vpop.f32.mrb[10].mxu1 }
 0x1eb   :  { %v620_v17 = vrot.slane %v736_v16, 1  ;;  %v600_v18 = vpop.f32.mrb[11].mxu1 }
 0x1ec   :  { %v615_v0 = vsel %vm326_vm1, %v609_v11, %v610_v13  ;;  %v619_v19 = vrot.slane %v600_v18, 1 }
 0x1ed   :  { %v630_v20 = vadd.f32 %v615_v0, %v509_v14  ;;  %v513_v21 = vpop.f32.mrb[12].mxu0  ;;  %v624_v22 = vsel %vm335_vm2, %v620_v17, %v617_v9 }
 0x1ee   :  { %v622_v23 = vsel %vm335_vm2, %v618_v7, %v619_v19  ;;  %v611_v25 = vrot.slane %v513_v21, 7  ;;  %v515_v26 = vpop.f32.mrb[13].mxu0  ;;  %v621_v28 = vsel %vm335_vm2, %v619_v19, %v620_v17  ;;  %v636_v50 = vsel %vm1118_vm6, %v624_v22, 0.0 }
 0x1ef   :  { %v634_v30 = vsel %vm1100_vm4, %v622_v23, 0.0 }
 0x1f0   :  { %v638_v32 = vadd.f32 %v634_v30, %v630_v20  ;;  %v614_v33 = vsel %vm326_vm1, %v610_v13, %v611_v25 }
 0x1f1   :  { %v627_v34 = vsel %vm1095_vm3, %v614_v33, 0.0  ;;  %v519_v35 = vpop.f32.mrb[14].mxu0 }
 0x1f2   :  { %v649_v36 = vadd.f32 %v678_v31, %v638_v32  ;;  %v631_v38 = vadd.f32 %v627_v34, %v515_v26  ;;  %v612_v39 = vrot.slane %v519_v35, 7  ;;  %v521_v40 = vpop.f32.mrb[15].mxu0 }
 0x1f4   :  { %v653_v41 = vadd.f32 %v649_v36, %v1087_v15  ;;  %v639_v27 = vadd.f32 %v631_v38, %v621_v28  ;;  %v616_v42 = vsel %vm326_vm1, %v612_v39, %v609_v11  ;;  %v613_v45 = vsel %vm326_vm1, %v611_v25, %v612_v39 }
 0x1f5   :  { %v625_v46 = vsel %vm1114_vm5, %v616_v42, 0.0  ;;  %v632_v47 = vadd.f32 %v613_v45, %v521_v40 }
 0x1f6   :  { %v657_v24 = vmax.f32 %v653_v41, 0.0  ;;  %v650_v48 = vadd.f32 %v678_v31, %v639_v27  ;;  %v629_v49 = vadd.f32 %v625_v46, %v503_v4 }
 0x1f7   :  { %v640_v51 = vadd.f32 %v636_v50, %v632_v47 }
 0x1f8   :  { %661 = vst [vmem:[%s1190_s5 + $0x8] sm:$0xff] %v657_v24  ;;  %v654_v15 = vadd.f32 %v650_v48, %v1104_v29  ;;  %v637_v52 = vadd.f32 %v629_v49, %v623_v12 }
 0x1f9   :  { %v651_v63 = vadd.f32 %v678_v31, %v640_v51 }
 0x1fa   :  { %v658_v53 = vmax.f32 %v654_v15, 0.0  ;;  %v648_v54 = vadd.f32 %v678_v31, %v637_v52 }
 0x1fb   :  { %v655_v37 = vadd.f32 %v651_v63, %v1122_v44 }
 0x1fc   :  { %662 = vst [vmem:[%s1190_s5 + $0x10] sm:$0xff] %v658_v53  ;;  %v652_v43 = vadd.f32 %v648_v54, %v1083_v5 }
 0x1fd   :  { %v659_v55 = vmax.f32 %v655_v37, 0.0 }
 0x1fe   :  { %v656_v56 = vmax.f32 %v652_v43, 0.0 }
 0x1ff   :  { %663 = vst [vmem:[%s1190_s5 + $0x18] sm:$0xff] %v659_v55 }
 0x200   :  { %660 = vst [vmem:[%s1190_s5] sm:$0xff] %v656_v56 }
 0x201   :  { %668 = vsyncpa [#allocation3], 1 }

</bundles_post_ra>
